<compile_context>
chip_gen: v7x
topology: tpu7x:2x2x1
jax: 0.10.0
libtpu: 0.0.40
codegen_flags: <defaults>
</compile_context>

<pallas_src>
import functools

import jax
import jax.numpy as jnp
from jax.experimental import pallas as pl
from jax.experimental.pallas import tpu as pltpu


HIDDEN = 32              # decoder hidden width
FEAT_IN = 9              # normals(3) + points(3) + view_dir(3)
FEAT_K = FEAT_IN + 1     # + ones row so b1 rides inside the single matmul
FEAT_OUT = 3             # rgb
DEFAULT_TILE_N = 32768   # points / grid step (sweep 16384..65536 on v5e/v6e; 32768 cap for v7x VMEM)
VMEM_LIMIT_BYTES = 48 * 1024 * 1024   # explicit scoped limit; actual use ~15-20 MiB at T=32768
MAX_SELECT_CLOUDS = 8    # <= this many clouds -> where/select camera gather (no one-hot matmul)


def _round_up(x, m):
    return (x + m - 1) // m * m


def _choose_tile(n, max_tile):
    """Lane-dense tile so the 1-D grid has an even number of steps (v7x has 2 TCs)."""
    steps = -(-n // max_tile)
    if steps == 1 and n > 128:
        steps = 2
    if steps > 1 and steps % 2:
        steps += 1
    tile = _round_up(-(-n // steps), 128)
    return max(128, min(max_tile, tile))


def _neural_texture_kernel(np_ref, idx_ref, cam_ref, w1_ref, w2_ref, rgb_ref,
                           feat_ref, *, num_clouds, hidden):
    np6 = np_ref[...]                        # (6, T): rows 0-2 normals, rows 3-5 points
    idx = idx_ref[...].astype(jnp.int32)     # (1, T) cloud index per point
    cam_all = cam_ref[...]                   # (3, C_pad) camera centers, channels-first
    t = np_ref.shape[1]

    p = np6[3:6, :]                          # (3, T) points

    # --- per-point camera center ---
    if num_clouds <= MAX_SELECT_CLOUDS:
        # Small cloud count: select chain, pure VPU, no large intermediate.
        cam = jnp.zeros_like(p)
        for c in range(num_clouds):          # static unroll (num_clouds is trace-time)
            cam = jnp.where(idx == c, cam_all[:, c:c + 1], cam)
    else:
        # Many clouds: exact gather via one-hot matmul.
        c_pad = cam_ref.shape[1]
        clouds = jax.lax.broadcasted_iota(jnp.int32, (c_pad, t), 0)
        onehot = (clouds == idx).astype(jnp.float32)                      # (C_pad, T)
        cam = jnp.dot(cam_all, onehot, preferred_element_type=jnp.float32)  # (3, T)

    # --- view direction = normalize(p - cam), eps-clamped (rsqrt -> EUP slot) ---
    vd = p - cam
    sumsq = (vd[0:1, :] * vd[0:1, :]
             + vd[1:2, :] * vd[1:2, :]
             + vd[2:3, :] * vd[2:3, :])                      # two VPU adds, no XLU reduce
    vd = vd * jax.lax.rsqrt(jnp.maximum(sumsq, 1e-24))       # == clamp(norm, 1e-12)

    # --- assemble (10, T) feature buffer; every row rewritten each step (no init) ---
    feat_ref[0:6, :] = np6                                   # normals + points
    feat_ref[6:9, :] = vd                                    # view direction
    feat_ref[9:10, :] = jnp.ones((1, t), jnp.float32)        # bias row (b1 in the matmul)

    # --- decoder MLP: one fused K=10 dot (bias folded), then (3,H) dot + b2 ---
    h = jnp.dot(w1_ref[...], feat_ref[...], preferred_element_type=jnp.float32)  # (H, T)
    h = jnp.maximum(h, 0.0)
    # TODO(synk): optionally cast h to bf16 here (halves the largest intermediate) if
    #             the consumer tolerates ~1e-3 output error.
    o = (jnp.dot(w2_ref[:, :hidden], h, preferred_element_type=jnp.float32)
         + w2_ref[:, hidden:hidden + 1])                      # (3, T)
    rgb_ref[...] = jax.nn.sigmoid(o).astype(rgb_ref.dtype)


def neural_texture_forward(normals_points_cf, cloud_idx, cam_centers,
                           w1, b1, w2, b2, *, max_tile_n=DEFAULT_TILE_N):
    """normals_points_cf: (6, N) f32 channels-first (rows 0-2 normals, 3-5 points).
    cloud_idx: (N,) int cloud index per packed point. cam_centers: (num_clouds, 3) f32.
    w1: (9, H), b1: (H,), w2: (H, 3), b2: (3,). Returns rgb channels-first (3, N) f32."""
    assert normals_points_cf.shape[0] == 6
    N = normals_points_cf.shape[1]
    num_clouds = cam_centers.shape[0]
    hidden = w1.shape[1]

    tile_n = _choose_tile(N, max_tile_n)
    n_pad = _round_up(N, tile_n)
    pad = n_pad - N
    grid = (n_pad // tile_n,)

    np_cf = normals_points_cf.astype(jnp.float32)
    idx_cf = cloud_idx.reshape(1, N)
    if pad:
        np_cf = jnp.pad(np_cf, ((0, 0), (0, pad)))
        idx_cf = jnp.pad(idx_cf, ((0, 0), (0, pad)))

    c_pad = _round_up(num_clouds, 8)
    cam_cf = jnp.pad(cam_centers.astype(jnp.float32),
                     ((0, c_pad - num_clouds), (0, 0))).T            # (3, c_pad)

    # [W1 | b1] as (H, 10) acting on the (10, T) feature buffer; [W2 | b2] as (3, H+1).
    w1big = jnp.concatenate([w1.T, b1.reshape(-1, 1)], axis=1).astype(jnp.float32)
    w2aug = jnp.concatenate([w2.T, b2.reshape(-1, 1)], axis=1).astype(jnp.float32)

    kernel = functools.partial(_neural_texture_kernel,
                               num_clouds=num_clouds, hidden=hidden)

    cost = pl.CostEstimate(
        flops=2 * n_pad * (hidden * FEAT_K + FEAT_OUT * hidden),
        transcendentals=4 * n_pad,
        bytes_accessed=n_pad * (6 * 4 + 4 + FEAT_OUT * 4))

    rgb_cf = pl.pallas_call(
        kernel,
        out_shape=jax.ShapeDtypeStruct((FEAT_OUT, n_pad), jnp.float32),
        grid_spec=pltpu.PrefetchScalarGridSpec(
            num_scalar_prefetch=0,
            grid=grid,
            in_specs=[
                pl.BlockSpec((6, tile_n), lambda i: (0, i)),            # normals+points
                pl.BlockSpec((1, tile_n), lambda i: (0, i)),            # cloud idx
                # Constant block index -> Pallas does not re-DMA these per step.
                pl.BlockSpec((3, c_pad), lambda i: (0, 0)),             # camera centers
                pl.BlockSpec((hidden, FEAT_K), lambda i: (0, 0)),       # [W1 | b1]
                pl.BlockSpec((FEAT_OUT, hidden + 1), lambda i: (0, 0)),  # [W2 | b2]
            ],
            out_specs=pl.BlockSpec((FEAT_OUT, tile_n), lambda i: (0, i)),
            scratch_shapes=[pltpu.VMEM((FEAT_K, tile_n), jnp.float32)],
        ),
        compiler_params=pltpu.CompilerParams(
            dimension_semantics=("parallel",),
            vmem_limit_bytes=VMEM_LIMIT_BYTES),
        cost_estimate=cost,
    )(np_cf, idx_cf, cam_cf, w1big, w2aug)

    return rgb_cf if pad == 0 else rgb_cf[:, :N]                      # (3, N)


def reference_forward(normals, points, cloud_idx, cam_centers, w1, b1, w2, b2):
    cam = cam_centers[cloud_idx]
    vd = points - cam
    norm = jnp.sqrt(jnp.sum(vd * vd, axis=-1, keepdims=True))
    vd = vd / jnp.maximum(norm, 1e-12)
    x = jnp.concatenate([normals, points, vd], axis=-1)
    h = jnp.maximum(x @ w1 + b1, 0.0)
    return jax.nn.sigmoid(h @ w2 + b2)


if __name__ == "__main__":
    key = jax.random.PRNGKey(0)
    k_pts, k_nrm, k_cam, k_w1, k_b1, k_w2, k_b2 = jax.random.split(key, 7)

    # Two point clouds of 100 points each -> packed N = 200 (exercises tile padding).
    num_clouds, pts_per_cloud = 2, 100
    N = num_clouds * pts_per_cloud

    points = jax.random.normal(k_pts, (N, 3), dtype=jnp.float32)
    normals_raw = jax.random.normal(k_nrm, (N, 3), dtype=jnp.float32)
    normals = normals_raw / jnp.linalg.norm(normals_raw, axis=-1, keepdims=True)

    # One camera center per cloud; per-point cloud index (gather done in-kernel).
    cam_centers = jax.random.normal(k_cam, (num_clouds, 3), dtype=jnp.float32) * 3.0
    cloud_idx = jnp.repeat(jnp.arange(num_clouds, dtype=jnp.int32), pts_per_cloud)

    # Deterministic decoder parameters.
    w1 = jax.random.normal(k_w1, (FEAT_IN, HIDDEN), dtype=jnp.float32) * 0.3
    b1 = jax.random.normal(k_b1, (HIDDEN,), dtype=jnp.float32) * 0.1
    w2 = jax.random.normal(k_w2, (HIDDEN, FEAT_OUT), dtype=jnp.float32) * 0.3
    b2 = jax.random.normal(k_b2, (FEAT_OUT,), dtype=jnp.float32) * 0.1

    # Producer-side channels-first packing (rows 0-2 normals, 3-5 points): the kernel
    # consumes and produces channels-first, so no per-call HBM transposes remain.
    normals_points_cf = jnp.concatenate([normals.T, points.T], axis=0)   # (6, N)

    rgb_cf = neural_texture_forward(normals_points_cf, cloud_idx, cam_centers,
                                    w1, b1, w2, b2)
    rgb_cf = jax.block_until_ready(rgb_cf)

    ref = reference_forward(normals, points, cloud_idx, cam_centers, w1, b1, w2, b2)
    assert rgb_cf.shape == (FEAT_OUT, N)
    assert jnp.max(jnp.abs(rgb_cf.T - ref)) < 1e-4

    print("KERNEL_OK")
</pallas_src>

<mosaic_0001>
module attributes {stable_mosaic.version = 11 : i64} {
  func.func @_neural_texture_kernel(%arg0: i32, %arg1: memref<6x128xf32, #tpu.memory_space<vmem>>, %arg2: memref<1x128xi32, #tpu.memory_space<vmem>>, %arg3: memref<3x8xf32, #tpu.memory_space<vmem>>, %arg4: memref<32x10xf32, #tpu.memory_space<vmem>>, %arg5: memref<3x33xf32, #tpu.memory_space<vmem>>, %arg6: memref<3x128xf32, #tpu.memory_space<vmem>>, %arg7: memref<10x128xf32, #tpu.memory_space<vmem>>) attributes {dimension_semantics = [#tpu.dimension_semantics<parallel>], iteration_bounds = array<i64: 2>, scalar_prefetch = 0 : i64, scratch_operands = 1 : i64, tpu.core_type = #tpu.core_type<tc>, window_params = [{transform_indices = @transform_0, window_bounds = array<i64: 6, 128>}, {transform_indices = @transform_1, window_bounds = array<i64: 1, 128>}, {pipeline_mode = #tpu.pipeline_mode<synchronous>, transform_indices = @transform_2, window_bounds = array<i64: 3, 8>}, {pipeline_mode = #tpu.pipeline_mode<synchronous>, transform_indices = @transform_3, window_bounds = array<i64: 32, 10>}, {pipeline_mode = #tpu.pipeline_mode<synchronous>, transform_indices = @transform_4, window_bounds = array<i64: 3, 33>}, {transform_indices = @transform_5, window_bounds = array<i64: 3, 128>}]} {
    %c0 = arith.constant 0 : index
    %c0_0 = arith.constant 0 : index
    %0 = vector.load %arg1[%c0, %c0_0] : memref<6x128xf32, #tpu.memory_space<vmem>>, vector<6x128xf32>
    %c0_1 = arith.constant 0 : index
    %c0_2 = arith.constant 0 : index
    %1 = vector.load %arg2[%c0_1, %c0_2] : memref<1x128xi32, #tpu.memory_space<vmem>>, vector<1x128xi32>
    %c0_3 = arith.constant 0 : index
    %c0_4 = arith.constant 0 : index
    %2 = vector.load %arg3[%c0_3, %c0_4] : memref<3x8xf32, #tpu.memory_space<vmem>>, vector<3x8xf32>
    %3 = vector.extract_strided_slice %0 {offsets = [3, 0], sizes = [3, 128], strides = [1, 1]} : vector<6x128xf32> to vector<3x128xf32>
    %cst = arith.constant 0.000000e+00 : f32
    %4 = vector.broadcast %cst : f32 to vector<3x128xf32>
    %c0_i32 = arith.constant 0 : i32
    %5 = vector.broadcast %c0_i32 : i32 to vector<1x128xi32>
    %6 = arith.cmpi eq, %1, %5 : vector<1x128xi32>
    %7 = vector.extract_strided_slice %2 {offsets = [0, 0], sizes = [3, 1], strides = [1, 1]} : vector<3x8xf32> to vector<3x1xf32>
    %8 = vector.shape_cast %6 : vector<1x128xi1> to vector<1x128xi1>
    %9 = vector.broadcast %8 : vector<1x128xi1> to vector<3x128xi1>
    %10 = vector.shape_cast %7 : vector<3x1xf32> to vector<3x1xf32>
    %11 = vector.broadcast %10 : vector<3x1xf32> to vector<3x128xf32>
    %12 = arith.select %9, %11, %4 : vector<3x128xi1>, vector<3x128xf32>
    %c1_i32 = arith.constant 1 : i32
    %13 = vector.broadcast %c1_i32 : i32 to vector<1x128xi32>
    %14 = arith.cmpi eq, %1, %13 : vector<1x128xi32>
    %15 = vector.extract_strided_slice %2 {offsets = [0, 1], sizes = [3, 1], strides = [1, 1]} : vector<3x8xf32> to vector<3x1xf32>
    %16 = vector.shape_cast %14 : vector<1x128xi1> to vector<1x128xi1>
    %17 = vector.broadcast %16 : vector<1x128xi1> to vector<3x128xi1>
    %18 = vector.shape_cast %15 : vector<3x1xf32> to vector<3x1xf32>
    %19 = vector.broadcast %18 : vector<3x1xf32> to vector<3x128xf32>
    %20 = arith.select %17, %19, %12 : vector<3x128xi1>, vector<3x128xf32>
    %21 = arith.subf %3, %20 : vector<3x128xf32>
    %22 = vector.extract_strided_slice %21 {offsets = [0, 0], sizes = [1, 128], strides = [1, 1]} : vector<3x128xf32> to vector<1x128xf32>
    %23 = vector.extract_strided_slice %21 {offsets = [0, 0], sizes = [1, 128], strides = [1, 1]} : vector<3x128xf32> to vector<1x128xf32>
    %24 = arith.mulf %22, %23 : vector<1x128xf32>
    %25 = vector.extract_strided_slice %21 {offsets = [1, 0], sizes = [1, 128], strides = [1, 1]} : vector<3x128xf32> to vector<1x128xf32>
    %26 = vector.extract_strided_slice %21 {offsets = [1, 0], sizes = [1, 128], strides = [1, 1]} : vector<3x128xf32> to vector<1x128xf32>
    %27 = arith.mulf %25, %26 : vector<1x128xf32>
    %28 = arith.addf %24, %27 : vector<1x128xf32>
    %29 = vector.extract_strided_slice %21 {offsets = [2, 0], sizes = [1, 128], strides = [1, 1]} : vector<3x128xf32> to vector<1x128xf32>
    %30 = vector.extract_strided_slice %21 {offsets = [2, 0], sizes = [1, 128], strides = [1, 1]} : vector<3x128xf32> to vector<1x128xf32>
    %31 = arith.mulf %29, %30 : vector<1x128xf32>
    %32 = arith.addf %28, %31 : vector<1x128xf32>
    %cst_5 = arith.constant 1.000000e-24 : f32
    %33 = vector.broadcast %cst_5 : f32 to vector<1x128xf32>
    %34 = arith.maximumf %32, %33 : vector<1x128xf32>
    %35 = math.rsqrt %34 : vector<1x128xf32>
    %36 = vector.broadcast %35 : vector<1x128xf32> to vector<3x128xf32>
    %37 = arith.mulf %21, %36 : vector<3x128xf32>
    %c0_6 = arith.constant 0 : index
    %c0_7 = arith.constant 0 : index
    %38 = vector.load %arg7[%c0_6, %c0_7] : memref<10x128xf32, #tpu.memory_space<vmem>>, vector<6x128xf32>
    tpu.vector_store %arg7[%c0_6, %c0_7], %0 {strides = array<i32>} : memref<10x128xf32, #tpu.memory_space<vmem>>, vector<6x128xf32>,
    %c6 = arith.constant 6 : index
    %c0_8 = arith.constant 0 : index
    %39 = vector.load %arg7[%c6, %c0_8] : memref<10x128xf32, #tpu.memory_space<vmem>>, vector<3x128xf32>
    tpu.vector_store %arg7[%c6, %c0_8], %37 {strides = array<i32>} : memref<10x128xf32, #tpu.memory_space<vmem>>, vector<3x128xf32>,
    %cst_9 = arith.constant 1.000000e+00 : f32
    %40 = vector.broadcast %cst_9 : f32 to vector<1x128xf32>
    %c9 = arith.constant 9 : index
    %c0_10 = arith.constant 0 : index
    %41 = vector.load %arg7[%c9, %c0_10] : memref<10x128xf32, #tpu.memory_space<vmem>>, vector<1x128xf32>
    tpu.vector_store %arg7[%c9, %c0_10], %40 {strides = array<i32>} : memref<10x128xf32, #tpu.memory_space<vmem>>, vector<1x128xf32>,
    %c0_11 = arith.constant 0 : index
    %c0_12 = arith.constant 0 : index
    %42 = vector.load %arg4[%c0_11, %c0_12] : memref<32x10xf32, #tpu.memory_space<vmem>>, vector<32x10xf32>
    %c0_13 = arith.constant 0 : index
    %c0_14 = arith.constant 0 : index
    %43 = vector.load %arg7[%c0_13, %c0_14] : memref<10x128xf32, #tpu.memory_space<vmem>>, vector<10x128xf32>
    %cst_15 = arith.constant dense<0.000000e+00> : vector<32x128xf32>
    %44 = tpu.matmul %42, %43, %cst_15 {dimension_numbers = #tpu.dot_dimension_numbers<[1], [0], [0], [1], [0, 0, 1, 1], [], []>} : vector<32x10xf32>, vector<10x128xf32>, vector<32x128xf32> -> vector<32x128xf32>
    %cst_16 = arith.constant 0.000000e+00 : f32
    %45 = vector.broadcast %cst_16 : f32 to vector<32x128xf32>
    %46 = arith.maximumf %44, %45 : vector<32x128xf32>
    %c0_17 = arith.constant 0 : index
    %c0_18 = arith.constant 0 : index
    %47 = vector.load %arg5[%c0_17, %c0_18] : memref<3x33xf32, #tpu.memory_space<vmem>>, vector<3x32xf32>
    %cst_19 = arith.constant dense<0.000000e+00> : vector<3x128xf32>
    %48 = tpu.matmul %47, %46, %cst_19 {dimension_numbers = #tpu.dot_dimension_numbers<[1], [0], [0], [1], [0, 0, 1, 1], [], []>} : vector<3x32xf32>, vector<32x128xf32>, vector<3x128xf32> -> vector<3x128xf32>
    %c0_20 = arith.constant 0 : index
    %c32 = arith.constant 32 : index
    %49 = vector.load %arg5[%c0_20, %c32] : memref<3x33xf32, #tpu.memory_space<vmem>>, vector<3x1xf32>
    %50 = vector.broadcast %49 : vector<3x1xf32> to vector<3x128xf32>
    %51 = arith.addf %48, %50 : vector<3x128xf32>
    %52 = arith.negf %51 : vector<3x128xf32>
    %53 = math.exp %52 : vector<3x128xf32>
    %cst_21 = arith.constant 1.000000e+00 : f32
    %54 = vector.broadcast %cst_21 : f32 to vector<3x128xf32>
    %55 = arith.addf %54, %53 : vector<3x128xf32>
    %56 = arith.divf %54, %55 : vector<3x128xf32>
    %c0_22 = arith.constant 0 : index
    %c0_23 = arith.constant 0 : index
    %57 = vector.load %arg6[%c0_22, %c0_23] : memref<3x128xf32, #tpu.memory_space<vmem>>, vector<3x128xf32>
    tpu.vector_store %arg6[%c0_22, %c0_23], %56 {strides = array<i32>} : memref<3x128xf32, #tpu.memory_space<vmem>>, vector<3x128xf32>,
    return
  }
  func.func @transform_0(%arg0: i32) -> (i32, i32) {
    %c0_i32 = arith.constant 0 : i32
    %c0_i32_0 = arith.constant 0 : i32
    return %c0_i32, %arg0 : i32, i32
  }
  func.func @transform_1(%arg0: i32) -> (i32, i32) {
    %c0_i32 = arith.constant 0 : i32
    %c0_i32_0 = arith.constant 0 : i32
    return %c0_i32, %arg0 : i32, i32
  }
  func.func @transform_2(%arg0: i32) -> (i32, i32) {
    %c0_i32 = arith.constant 0 : i32
    %c0_i32_0 = arith.constant 0 : i32
    %c0_i32_1 = arith.constant 0 : i32
    return %c0_i32, %c0_i32_0 : i32, i32
  }
  func.func @transform_3(%arg0: i32) -> (i32, i32) {
    %c0_i32 = arith.constant 0 : i32
    %c0_i32_0 = arith.constant 0 : i32
    %c0_i32_1 = arith.constant 0 : i32
    return %c0_i32, %c0_i32_0 : i32, i32
  }
  func.func @transform_4(%arg0: i32) -> (i32, i32) {
    %c0_i32 = arith.constant 0 : i32
    %c0_i32_0 = arith.constant 0 : i32
    %c0_i32_1 = arith.constant 0 : i32
    return %c0_i32, %c0_i32_0 : i32, i32
  }
  func.func @transform_5(%arg0: i32) -> (i32, i32) {
    %c0_i32 = arith.constant 0 : i32
    %c0_i32_0 = arith.constant 0 : i32
    return %c0_i32, %arg0 : i32, i32
  }
}

</mosaic_0001>

<bundles_post_ra>
// kernel: tpu_custom_call.1
= control target key start
LH: loop header
LB: loop body
LE: loop exit
PB: predicated region body
PF: predicated region fallthrough
CT: control target
= control target key end

     0   :  { %10 = vsyncpa [#allocation4], 0  ;;  %s910_s0 = inlined_call_operand.vmem [shape: f32[6,256], index: 0, kind: input, shape index: {}]   ;;  %s911_s1 = inlined_call_operand.vmem [shape: s32[1,256], index: 1, kind: input, shape index: {}]   ;;  %s912_s2 = inlined_call_operand.vmem [shape: f32[3,8], index: 2, kind: input, shape index: {}]   ;;  %s913_s3 = inlined_call_operand.vmem [shape: f32[32,10], index: 3, kind: input, shape index: {}]   ;;  %s914_s4 = inlined_call_operand.vmem [shape: f32[3,33], index: 4, kind: input, shape index: {}]   ;;  %s915_s5 = inlined_call_operand.hbm [shape: f32[3,256], index: 5, kind: output, shape index: {}]  }
   0x1   :  { %12 = vsyncpa [#allocation4 + $0x1], 0  ;;  %s785_s18 = smov 0   ;;  %s787_s19 = smov 0  }
   0x2   :  { %s789_s20 = smov 0   ;;  %s791_s21 = smov 0  }
   0x3 LB: > { %s806_s22 = sadd.s32 4294967295, %s744_s21   ;;  %s564_s23 = sadd.s32 4294967294, %s744_s21   ;;  %s744_s21 = sphi %s791_s21, %s921_s21   ;;  %s740_s20 = sphi %s789_s20, %s920_s20   ;;  %s736_s19 = sphi %s787_s19, %s919_s19   ;;  %s732_s18 = sphi %s785_s18, %s918_s18  }
   0x4   : > { %s810_s24 = sadd.s32 1, %s744_s21   ;;  %s140_s25 = sadd.s32 1, %s740_s20 }
   0x5   : > { %s137_s26 = ssub.s32 %s744_s21, %s810_s24  ;;  %p150_p0 = scmp.ne.s32.totalorder %s740_s20, %s736_s19 }
   0x6   : > { %p138_p1 = scmp.eq.s32.totalorder %s137_s26, 0  ;;  %p151_p2 = scmp.eq.s32.totalorder %s806_s22, 1 }
   0x7   : > { %p156_p3 = scmp.ne.s32.totalorder %s736_s19, %s732_s18  ;;  %p157_p4 = scmp.eq.s32.totalorder %s564_s23, 1 }
   0x8   : > { %s821_s27 = scalar_select %p138_p1, %s740_s20, %s140_s25  }
   0x9   : > { %p823_p5 = por %p151_p2, %p150_p0  ;;  %p827_p6 = por %p157_p4, %p156_p3 }
   0xa   : > { %p567_p7 = scmp.ge.s32.totalorder %s744_s21, 1  ;;  %p197_p8 = scmp.lt.s32.totalorder %s744_s21, 3 }
   0xc   : > { %p198_p9 = pnand %p567_p7, %p197_p8 }
   0xd   : > { %p227_p10 = scmp.lt.s32.totalorder (!%p198_p9), %s806_s22, 1  ;;  %v236_v0 = vld [vmem:[%s912_s2] sm:$0x7] (!%p198_p9)  ;;  %v746_v1 = vmov (!%p198_p9), 0   ;;  %v747_v3 = vmov (!%p198_p9), 1   ;;  %v748_v7 = vmov (!%p198_p9), 1.0   ;;  %v239_v9 = vlaneseq (!%p198_p9) }
   0xe   : > { %201 = sbr.rel (%p198_p9) target bundleno = 670 (0x29e), region = 40  ;;  %672 = vset.pattern.permute.xlu0 (!%p198_p9), %v746_v1  ;;  %283 = vst [vmem:[#allocation2 + $0x9] sm:$0x1] (!%p198_p9), %v748_v7  ;;  %v284_v8 = vld [vmem:[%s913_s3] sm:$0xff] (!%p198_p9)  ;;  %vm290_vm2 = vcmask (!%p198_p9), 80896   ;;  %vm303_vm5 = vcmask (!%p198_p9), 1041408  }
   0xf   : > { %246 = vperm.xlu0 (!%p198_p9), %672, %v236_v0   ;;  %596 = vmatprep.mubr.msk.f32.mxu0 (!%p198_p9), %vm290_vm2, %v284_v8  ;;  %v240_v10 = vshrl.u32 (!%p198_p9), %v239_v9, 7  ;;  %vm749_vm6 = vmmov (!%p198_p9), 1   ;;  %v285_v33 = vld [vmem:[%s913_s3 + $0x8] sm:$0xff] (!%p198_p9)  ;;  %v286_v34 = vld [vmem:[%s913_s3 + $0x10] sm:$0xff] (!%p198_p9)  ;;  %v287_v35 = vld [vmem:[%s913_s3 + $0x18] sm:$0xff] (!%p198_p9)  ;;  %v750_v36 = vmov (!%p198_p9), 0.0|0.0  }
  0x10   : > { %vm614_vm7 = vmpackc.low (!%p198_p9), %vm303_vm5, %vm749_vm6  ;;  %619 = vmatprep.subr.bf16.mxu1 (!%p198_p9), %v750_v36  ;;  %vm751_vm8 = vmmov (!%p198_p9), 0   ;;  %v752_v37 = vmov (!%p198_p9), 0.0   ;;  %v396_v38 = vld [vmem:[%s914_s4] sm:$0x7] (!%p198_p9)  ;;  %v753_v39 = vmov (!%p198_p9), 32   ;;  %vm402_vm9 = vcmask (!%p198_p9), 261120  }
  0x11   : > { %v241_v11 = vsub.s32 (!%p198_p9), 0, %v240_v10  ;;  %v278_v26 = vsub.s32 (!%p198_p9), 3, %v240_v10  ;;  %610 = vmatprep.mubr.msk.f32.mxu1 (!%p198_p9), %vm751_vm8, %v752_v37  ;;  %674 = vset.pattern.permute.xlu1 (!%p198_p9), %v753_v39  ;;  %s224_s9 = sand.u32 (!%p198_p9), 1, %s736_s19  }
  0x12   : > { %399 = vperm.xlu1 (!%p198_p9), %674, %v396_v38   ;;  %s483_s17 = scalar_lea.sflag (!%p198_p9), [#allocation4], %s224_s9 }
  0x13   : > { %673 = vset.pattern.permute.xlu0 (!%p198_p9), %v747_v3 }
  0x14   : > { %258 = vperm.xlu0 (!%p198_p9), %673, %v236_v0  }
  0x15   : > { %s228_s7 = scalar_select %p227_p10, %s806_s22, 1 }
  0x17   : > { %s233_s10 = scalar_lea.vmem %s911_s1, %s228_s7  ;;  %s569_s11 = sshll.u32 %s228_s7, 3 }
  0x18   : > { %v235_v2 = vld [vmem:[%s233_s10] sm:$0x1]  ;;  %s230_s14 = scalar_lea.vmem %s910_s0, %s569_s11  ;;  %675 = vset.pattern.permute.xlu0 %v753_v39  ;;  %s568_s10 = sshll.u32 %s224_s9, 2 }
  0x19   : > { %vm250_vm0 = vcmp.eq.s32.totalorder %v235_v2, 1  ;;  %vm237_vm1 = vcmp.eq.s32.totalorder %v235_v2, 0  ;;  %v234_v6 = vld [vmem:[%s230_s14] sm:$0x3f]  ;;  %s578_s11 = sshll.u32 %s806_s22, 6  ;;  %s226_s12 = scalar_lea.vmem [#allocation3], %s568_s10 }
  0x1a   : > { %v251_v4 = vsel %vm250_vm0, 1, %v746_v1  ;;  %v238_v5 = vsel %vm237_vm1, 1, %v746_v1  ;;  %281 = vst [vmem:[#allocation2] sm:$0x3f] %v234_v6  ;;  %s496_s13 = sshll.u32 %s226_s12, 4  ;;  %s868_s16 = scalar_lea.hbm %s915_s5, %s578_s11  ;;  %s870_s13 = int_to_ptr.vmem [resolvable:$true] %s496_s13 }
  0x1b   : > { %v242_v12 = vrot.slane %v238_v5, %v241_v11  ;;  %v255_v13 = vrot.slane %v251_v4, %v241_v11  ;;  %s682_s23 = scalar_lea.vmem %s870_s13, 64  ;;  %s754_s22 = smov [#allocation3]  }
  0x1c   : > { %p683_p11 = scmp.ne.s32.totalorder %s870_s13, %s682_s23  ;;  %s686_s25 = sshll.u32 %s754_s22, 4  ;;  %s687_s25 = int_to_ptr.vmem [resolvable:$false] %s686_s25 }
  0x1d   : > { %vm243_vm3 = vcmp.eq.s32.totalorder %v242_v12, 1  ;;  %vm256_vm4 = vcmp.eq.s32.totalorder %v255_v13, 1  ;;  %s688_s26 = scalar_lea.vmem %s687_s25, 128  ;;  %p689_p0 = scmp.lt.s32.totalorder %s870_s13, %s687_s25 }
  0x1e   : > { %p684_p12 = pnand %p683_p11, %p823_p5  ;;  %p690_p1 = scmp.lt.s32.totalorder %s688_s26, %s682_s23 }
  0x20   : > { %p685_p13 = pneg %p684_p12  ;;  %p691_p2 = por %p690_p1, %p689_p0 }
  0x22   : > { %p692_p3 = pnand %p691_p2, %p685_p13 }
  0x8e   : > { %v247_v14 = vpop.permute.xlu0 %246 }
  0x8f   : > { %v249_v15 = vsel %vm243_vm3, %v247_v14, 0.0 }
  0x91   : > { %v400_v50 = vpop.permute.xlu1 %399 }
  0x93   : > { %v259_v16 = vpop.permute.xlu0 %258 }
  0x94   : > { %v261_v17 = vsel %vm256_vm4, %v259_v16, %v249_v15 }
  0x95   : > { %v263_v18 = vrot.slane %v261_v17, 5 }
  0x97   : > { %v265_v19 = vsub.f32 %v234_v6, %v263_v18 }
  0x99   : > { %v266_v20 = vmul.f32 %v265_v19, %v265_v19 }
  0x9b   : > { %v268_v21 = vrot.slane %v266_v20, 1  ;;  %v271_v23 = vrot.slane %v266_v20, 2 }
  0x9d   : > { %v270_v22 = vadd.f32 %v268_v21, %v266_v20 }
  0x9f   : > { %v273_v24 = vadd.f32 %v271_v23, %v270_v22 }
  0xa1   : > { %v274_v25 = vmax.f32 %v273_v24, 1e-24 }
  0xa3   : > { %676 = vrsqrt.f32 %v274_v25 }
  0xad   : > { %v677_v27 = vpop.eup %676 }
  0xae   : > { %v279_v28 = vrot.slane %v677_v27, %v278_v26 }
  0xb0   : > { %v280_v29 = vmul.f32 %v279_v28, %v265_v19 }
  0xb2   : > { %282 = vst [vmem:[#allocation2 + $0x3] sm:$0x38] %v280_v29 }
  0xb9   : > { %v288_v30 = vld [vmem:[#allocation2] sm:$0xff]  ;;  %v289_v31 = vld [vmem:[#allocation2 + $0x8] sm:$0x3] }
  0xba   : > { %v613_v32 = vpack.c.bf16 %v289_v31, %v288_v30 }
  0xbc   : > { %615 = vmatprep.subr.msk.bf16.mxu0 %vm614_vm7, %v613_v32 }
  0xbd   : > { %618 = vmatpush3.bf16.msk.msra.mxu0 %vm614_vm7, %v613_v32 }
  0xc0   : > { %597 = vmatmul.mubr.msk.f32.vlgmr.msra.gmra.mrb[0].mxu0 %vm290_vm2, %v285_v33 }
  0xc1   : > { %599 = vmatprep.mubr.msk.f32.mxu0 %vm290_vm2, %v286_v34 }
  0xc4   : > { %600 = vmatmul.mubr.msk.f32.gmra.mrb[2].mxu0 %vm290_vm2, %v287_v35 }
 0x193   : > { %v598_v40 = vpop.f32.mrb[0].mxu0 }
 0x194   : > { %v393_v41 = vmax.f32 %v598_v40, 0.0  ;;  %v373_v42 = vpop.f32.mrb[1].mxu0 }
 0x195   : > { %v392_v43 = vmax.f32 %v373_v42, 0.0 }
 0x197   : > { %v601_v44 = vpop.f32.mrb[2].mxu0  ;;  %v620_v45 = vpack.c.bf16 %v393_v41, %v392_v43 }
 0x198   : > { %v395_v46 = vmax.f32 %v601_v44, 0.0  ;;  %v383_v47 = vpop.f32.mrb[3].mxu0 }
 0x199   : > { %v394_v48 = vmax.f32 %v383_v47, 0.0  ;;  %621 = vmatpush3.bf16.msra.mxu1 %v620_v45 }
 0x19a   : > { %622 = vmatprep.subr.bf16.mxu1 %v750_v36 }
 0x19b   : > { %v623_v49 = vpack.c.bf16 %v395_v46, %v394_v48 }
 0x19d   : > { %624 = vmatpush3.bf16.msra.mxu1 %v623_v49 }
 0x1a0   : > { %611 = vmatmul.mubr.msk.f32.vlgmr.msra.gmra.mrb[0].mxu1 %vm402_vm9, %v396_v38 }
 0x273   : > { %v471_v51 = vpop.f32.mrb[0].mxu1 }
 0x274   : > { %v472_v52 = vadd.f32 %v471_v51, %v400_v50  ;;  %v612_v53 = vpop.f32.mrb[1].mxu1 }
 0x276   : > { %v576_v54 = vmul.f32 -1.442695, %v472_v52 }
 0x278   : > { %678 = vpow2.f32 %v576_v54 }
 0x282   : > { %v679_v55 = vpop.eup %678 }
 0x283   : > { %v478_v56 = vadd.f32 1.0, %v679_v55 }
 0x285   : > { %680 = vrcp.f32 %v478_v56 }
 0x28f   : > { %v681_v57 = vpop.eup %680 }
 0x290   : > { %481 = vst [vmem:[%s226_s12] sm:$0x7] %v681_v57 }
 0x291   : > { %695 = shalt.err (!%p692_p3)
}
 0x292   : > { %s696_s30 = scalar_lea.hbm %s868_s16, 64  ;;  %s700_s8 = scalar_lea.hbm %s915_s5, 128 }
 0x293   : > { %p697_p4 = scmp.ne.s32.totalorder %s868_s16, %s696_s30  ;;  %p701_p9 = scmp.lt.u32.totalorder %s868_s16, %s915_s5 }
 0x294   : > { %p702_p10 = scmp.lt.u32.totalorder %s700_s8, %s696_s30  ;;  %p704_p12 = scmp.lt.u32.totalorder %s696_s30, %s868_s16 }
 0x295   : > { %p698_p7 = pnand %p697_p4, %p823_p5 }
 0x296   : > { %p703_p11 = por %p702_p10, %p701_p9 }
 0x297   : > { %p699_p8 = pneg %p698_p7 }
 0x298   : > { %p705_p13 = por %p704_p12, %p703_p11 }
 0x29a   : > { %p706_p0 = pnand %p705_p13, %p699_p8 }
 0x29c   : > { %709 = shalt.err (!%p706_p0)
}
 0x29d   : > { %625 = dma.vmem_to_hbm [thread:$0]  (%p823_p5), %s870_s13, 64, %s868_s16, %s483_s17  }
 0x29e PF: > { %p631_p1 = scmp.ge.s32.totalorder %s744_s21, 2  ;;  %s508_s11 = sand.u32 1, %s732_s18  }
 0x29f   : > { %s509_s12 = scalar_lea.sflag [#allocation4], %s508_s11 }
 0x2a0   : > { %p628_p2 = pnand %p631_p1, %p827_p6 }
 0x2a2   : > { %727 = dma.done.wait (!%p628_p2), %s509_s12, 64  }
 0x2a3   : > { %729 = vsyncadd (!%p628_p2), %s509_s12, 4294967232  ;;  %p15_p3 = scmp.ge.s32.totalorder %s810_s24, 4   ;;  %s918_s18 = smov %s736_s19 }
 0x2a4   : > { %s919_s19 = smov %s740_s20  ;;  %s920_s20 = smov %s821_s27 }
 0x2a5   : > { %s921_s21 = smov %s810_s24  ;;  %17 = sbr.rel (!%p15_p3) target bundleno = 3 (0x3), region = 78 }
 0x2ac   :  { %514 = vsyncpa [#allocation4], 1 }
 0x2ad   :  { %516 = vsyncpa [#allocation4 + $0x1], 1 }

</bundles_post_ra>
